<compile_context>
chip_gen: v7x
topology: tpu7x:2x2x1
jax: 0.10.0
libtpu: 0.0.40
codegen_flags: <defaults>
</compile_context>

<pallas_src>
import jax
import jax.numpy as jnp
from jax.experimental import pallas as pl
from jax.experimental.pallas import tpu as pltpu


def _round_up(x, m):
    return ((x + m - 1) // m) * m


def _mlp_sigmoid_kernel(x_ref, w1_ref, b1_ref, w2_ref, b2_ref, o_ref):
    # First linear: [TB, F] @ [F, 512] -> f32 accumulation on the MXU.
    h = jnp.dot(x_ref[...], w1_ref[...], preferred_element_type=jnp.float32)
    h = h + b1_ref[...]                      # f32 bias add (VPU, free under MXU)
    # Second linear: [TB, 512] @ [512, Cp]; cast h back to MXU input dtype
    # (no-op in the f32 path, bf16 in the bf16 path).
    logits = jnp.dot(h.astype(w2_ref.dtype), w2_ref[...],
                     preferred_element_type=jnp.float32)
    logits = logits + b2_ref[...]
    # Sigmoid (EUP exp path), store lane-dense f32 output.
    o_ref[...] = jax.nn.sigmoid(logits).astype(o_ref.dtype)


def classifier_forward(x, w1, b1, w2, b2, *, block_b=128, use_bf16=False):
    """x: [B, input_size]; w1: [input_size, 512]; b1: [512];
    w2: [512, num_class]; b2: [num_class] -> [B, num_class] float32.

    Weights are stored pre-transposed ([in, out]) so the kernel computes
    x @ W + b directly on the MXU.
    """
    B, F = x.shape
    H = w1.shape[1]
    C = w2.shape[1]

    # --- lane-dense output: pad num_class up to a multiple of 128 ---
    Cp = max(128, _round_up(C, 128))
    if Cp != C:
        w2 = jnp.pad(w2, ((0, 0), (0, Cp - C)))
        b2 = jnp.pad(b2, (0, Cp - C))

    # --- batch tiling: TB rows (multiple of 8 sublanes), pad B to a multiple ---
    TB = min(block_b, _round_up(B, 8))
    TB = _round_up(TB, 8)
    Bp = _round_up(B, TB)
    if Bp != B:
        x = jnp.pad(x, ((0, Bp - B), (0, 0)))

    in_dtype = jnp.bfloat16 if use_bf16 else jnp.float32
    x_c = x.astype(in_dtype)
    w1_c = w1.astype(in_dtype)
    w2_c = w2.astype(in_dtype)
    b1_2d = b1.reshape(1, H).astype(jnp.float32)
    b2_2d = b2.reshape(1, Cp).astype(jnp.float32)

    grid = (Bp // TB,)
    itemsize = jnp.dtype(in_dtype).itemsize

    # Real VMEM footprint: double-buffered activation tiles + resident weights
    # (assume double-buffered to be safe) + the f32 intermediate h.
    footprint = (
        2 * (TB * F + TB * Cp) * itemsize           # x / out tiles (pipelined)
        + 2 * (F * H + H * Cp) * itemsize           # weights
        + 2 * (H + Cp) * 4                          # biases (f32)
        + TB * H * 4                                # live intermediate h
    )
    vmem_budget = min(max(int(footprint * 1.5) + (4 << 20), 16 << 20), 48 << 20)

    cost = pl.CostEstimate(
        flops=2 * Bp * (F * H + H * Cp),
        transcendentals=Bp * Cp,                    # exp in sigmoid
        bytes_accessed=(Bp * F + F * H + H * Cp) * itemsize
        + (H + Cp) * 4 + Bp * Cp * 4,
    )

    out = pl.pallas_call(
        _mlp_sigmoid_kernel,
        out_shape=jax.ShapeDtypeStruct((Bp, Cp), jnp.float32),
        grid=grid,
        in_specs=[
            pl.BlockSpec((TB, F), lambda i: (i, 0)),   # x: tiled over batch
            pl.BlockSpec((F, H), lambda i: (0, 0)),    # w1: resident
            pl.BlockSpec((1, H), lambda i: (0, 0)),    # b1: resident
            pl.BlockSpec((H, Cp), lambda i: (0, 0)),   # w2: resident
            pl.BlockSpec((1, Cp), lambda i: (0, 0)),   # b2: resident
        ],
        out_specs=pl.BlockSpec((TB, Cp), lambda i: (i, 0)),
        compiler_params=pltpu.CompilerParams(
            dimension_semantics=("parallel",),
            vmem_limit_bytes=vmem_budget,
        ),
        cost_estimate=cost,
    )(x_c, w1_c, b1_2d, w2_c, b2_2d)

    return out[:B, :C]


def init_params(key, input_size, num_class, hidden=512):
    """Deterministic nn.Linear-style init: U(-1/sqrt(fan_in), 1/sqrt(fan_in)),
    stored as [in, out] (PyTorch weight transposed)."""
    k1, k2, k3, k4 = jax.random.split(key, 4)
    bound1 = 1.0 / jnp.sqrt(input_size)
    bound2 = 1.0 / jnp.sqrt(hidden)
    w1 = jax.random.uniform(k1, (input_size, hidden), jnp.float32, -bound1, bound1)
    b1 = jax.random.uniform(k2, (hidden,), jnp.float32, -bound1, bound1)
    w2 = jax.random.uniform(k3, (hidden, num_class), jnp.float32, -bound2, bound2)
    b2 = jax.random.uniform(k4, (num_class,), jnp.float32, -bound2, bound2)
    return w1, b1, w2, b2


if __name__ == "__main__":
    key = jax.random.PRNGKey(0)
    kx, kp, kx2 = jax.random.split(key, 3)

    B = 8
    INPUT_SIZE = 32
    NUM_CLASS = 10

    x = jax.random.normal(kx, (B, INPUT_SIZE), jnp.float32)
    w1, b1, w2, b2 = init_params(kp, INPUT_SIZE, NUM_CLASS)
    ref = jax.nn.sigmoid((x @ w1 + b1) @ w2 + b2)

    # f32 path (single grid step, lane-padded output)
    y = classifier_forward(x, w1, b1, w2, b2)
    y = jax.block_until_ready(y)
    assert y.shape == (B, NUM_CLASS)
    assert jnp.allclose(y, ref, atol=1e-5, rtol=1e-5)

    # bf16 MXU-input path (f32 accumulation) — looser tolerance
    y_bf16 = classifier_forward(x, w1, b1, w2, b2, use_bf16=True)
    y_bf16 = jax.block_until_ready(y_bf16)
    assert jnp.allclose(y_bf16, ref, atol=2e-2, rtol=2e-2)

    # Multi-step grid with batch padding (B not a multiple of the tile)
    B2 = 40
    x2 = jax.random.normal(kx2, (B2, INPUT_SIZE), jnp.float32)
    ref2 = jax.nn.sigmoid((x2 @ w1 + b1) @ w2 + b2)
    y2 = classifier_forward(x2, w1, b1, w2, b2, block_b=16)  # grid of 3 steps
    y2 = jax.block_until_ready(y2)
    assert y2.shape == (B2, NUM_CLASS)
    assert jnp.allclose(y2, ref2, atol=1e-5, rtol=1e-5)

    print("KERNEL_OK")
</pallas_src>

<mosaic_0001>
module attributes {stable_mosaic.version = 11 : i64} {
  func.func @_mlp_sigmoid_kernel(%arg0: i32, %arg1: memref<8x32xf32, #tpu.memory_space<vmem>>, %arg2: memref<32x512xf32, #tpu.memory_space<vmem>>, %arg3: memref<1x512xf32, #tpu.memory_space<vmem>>, %arg4: memref<512x128xf32, #tpu.memory_space<vmem>>, %arg5: memref<1x128xf32, #tpu.memory_space<vmem>>, %arg6: memref<8x128xf32, #tpu.memory_space<vmem>>) attributes {dimension_semantics = [#tpu.dimension_semantics<parallel>], iteration_bounds = array<i64: 1>, scalar_prefetch = 0 : i64, scratch_operands = 0 : i64, tpu.core_type = #tpu.core_type<tc>, window_params = [{transform_indices = @transform_0, window_bounds = array<i64: 8, 32>}, {pipeline_mode = #tpu.pipeline_mode<synchronous>, transform_indices = @transform_1, window_bounds = array<i64: 32, 512>}, {pipeline_mode = #tpu.pipeline_mode<synchronous>, transform_indices = @transform_2, window_bounds = array<i64: 1, 512>}, {pipeline_mode = #tpu.pipeline_mode<synchronous>, transform_indices = @transform_3, window_bounds = array<i64: 512, 128>}, {pipeline_mode = #tpu.pipeline_mode<synchronous>, transform_indices = @transform_4, window_bounds = array<i64: 1, 128>}, {transform_indices = @transform_5, window_bounds = array<i64: 8, 128>}]} {
    %c0 = arith.constant 0 : index
    %c0_0 = arith.constant 0 : index
    %0 = vector.load %arg1[%c0, %c0_0] : memref<8x32xf32, #tpu.memory_space<vmem>>, vector<8x32xf32>
    %c0_1 = arith.constant 0 : index
    %c0_2 = arith.constant 0 : index
    %1 = vector.load %arg2[%c0_1, %c0_2] : memref<32x512xf32, #tpu.memory_space<vmem>>, vector<32x512xf32>
    %cst = arith.constant dense<0.000000e+00> : vector<8x512xf32>
    %2 = tpu.matmul %0, %1, %cst {dimension_numbers = #tpu.dot_dimension_numbers<[1], [0], [0], [1], [0, 0, 1, 1], [], []>} : vector<8x32xf32>, vector<32x512xf32>, vector<8x512xf32> -> vector<8x512xf32>
    %c0_3 = arith.constant 0 : index
    %c0_4 = arith.constant 0 : index
    %3 = vector.load %arg3[%c0_3, %c0_4] : memref<1x512xf32, #tpu.memory_space<vmem>>, vector<1x512xf32>
    %4 = vector.broadcast %3 : vector<1x512xf32> to vector<8x512xf32>
    %5 = arith.addf %2, %4 : vector<8x512xf32>
    %c0_5 = arith.constant 0 : index
    %c0_6 = arith.constant 0 : index
    %6 = vector.load %arg4[%c0_5, %c0_6] : memref<512x128xf32, #tpu.memory_space<vmem>>, vector<512x128xf32>
    %cst_7 = arith.constant dense<0.000000e+00> : vector<8x128xf32>
    %7 = tpu.matmul %5, %6, %cst_7 {dimension_numbers = #tpu.dot_dimension_numbers<[1], [0], [0], [1], [0, 0, 1, 1], [], []>} : vector<8x512xf32>, vector<512x128xf32>, vector<8x128xf32> -> vector<8x128xf32>
    %c0_8 = arith.constant 0 : index
    %c0_9 = arith.constant 0 : index
    %8 = vector.load %arg5[%c0_8, %c0_9] : memref<1x128xf32, #tpu.memory_space<vmem>>, vector<1x128xf32>
    %9 = vector.broadcast %8 : vector<1x128xf32> to vector<8x128xf32>
    %10 = arith.addf %7, %9 : vector<8x128xf32>
    %11 = arith.negf %10 : vector<8x128xf32>
    %12 = math.exp %11 : vector<8x128xf32>
    %cst_10 = arith.constant 1.000000e+00 : f32
    %13 = vector.broadcast %cst_10 : f32 to vector<8x128xf32>
    %14 = arith.addf %13, %12 : vector<8x128xf32>
    %15 = arith.divf %13, %14 : vector<8x128xf32>
    %c0_11 = arith.constant 0 : index
    %c0_12 = arith.constant 0 : index
    %16 = vector.load %arg6[%c0_11, %c0_12] : memref<8x128xf32, #tpu.memory_space<vmem>>, vector<8x128xf32>
    tpu.vector_store %arg6[%c0_11, %c0_12], %15 {strides = array<i32>} : memref<8x128xf32, #tpu.memory_space<vmem>>, vector<8x128xf32>,
    return
  }
  func.func @transform_0(%arg0: i32) -> (i32, i32) {
    %c0_i32 = arith.constant 0 : i32
    %c0_i32_0 = arith.constant 0 : i32
    return %arg0, %c0_i32 : i32, i32
  }
  func.func @transform_1(%arg0: i32) -> (i32, i32) {
    %c0_i32 = arith.constant 0 : i32
    %c0_i32_0 = arith.constant 0 : i32
    %c0_i32_1 = arith.constant 0 : i32
    return %c0_i32, %c0_i32_0 : i32, i32
  }
  func.func @transform_2(%arg0: i32) -> (i32, i32) {
    %c0_i32 = arith.constant 0 : i32
    %c0_i32_0 = arith.constant 0 : i32
    %c0_i32_1 = arith.constant 0 : i32
    return %c0_i32, %c0_i32_0 : i32, i32
  }
  func.func @transform_3(%arg0: i32) -> (i32, i32) {
    %c0_i32 = arith.constant 0 : i32
    %c0_i32_0 = arith.constant 0 : i32
    %c0_i32_1 = arith.constant 0 : i32
    return %c0_i32, %c0_i32_0 : i32, i32
  }
  func.func @transform_4(%arg0: i32) -> (i32, i32) {
    %c0_i32 = arith.constant 0 : i32
    %c0_i32_0 = arith.constant 0 : i32
    %c0_i32_1 = arith.constant 0 : i32
    return %c0_i32, %c0_i32_0 : i32, i32
  }
  func.func @transform_5(%arg0: i32) -> (i32, i32) {
    %c0_i32 = arith.constant 0 : i32
    %c0_i32_0 = arith.constant 0 : i32
    return %arg0, %c0_i32 : i32, i32
  }
}

</mosaic_0001>

<bundles_post_ra>
// kernel: tpu_custom_call.1
= control target key start
LH: loop header
LB: loop body
LE: loop exit
PB: predicated region body
PF: predicated region fallthrough
CT: control target
= control target key end

     0   :  { %10 = vsyncpa [#allocation3], 0  ;;  %s835_s0 = inlined_call_operand.hbm [shape: f32[8,32], index: 0, kind: input, shape index: {}]   ;;  %s836_s1 = inlined_call_operand.hbm [shape: f32[32,512], index: 1, kind: input, shape index: {}]   ;;  %s837_s2 = inlined_call_operand.vmem [shape: f32[1,512], index: 2, kind: input, shape index: {}]   ;;  %s838_s3 = inlined_call_operand.hbm [shape: f32[512,128], index: 3, kind: input, shape index: {}]   ;;  %s839_s4 = inlined_call_operand.vmem [shape: f32[1,128], index: 4, kind: input, shape index: {}]   ;;  %s840_s5 = inlined_call_operand.hbm [shape: f32[8,128], index: 5, kind: output, shape index: {}]  }
   0x1   :  { %11 = vsyncpa [#allocation6], 0 }
   0x2   :  { %12 = vsyncpa [#allocation4], 0  ;;  %s740_s18 = smov [#allocation5]   ;;  %s646_s22 = scalar_lea.hbm %s836_s1, 2048 }
   0x3   :  { %s28_s19 = sshll.u32 %s740_s18, 4  ;;  %p647_p0 = scmp.ne.s32.totalorder %s836_s1, %s646_s22  ;;  %s29_s19 = int_to_ptr.vmem [resolvable:$true] %s28_s19 }
   0x4   :  { %p650_p1 = scmp.lt.u32.totalorder %s646_s22, %s836_s1 }
   0x6   :  { %p652_p2 = pnand %p650_p1, %p647_p0 }
   0x8   :  { %655 = shalt.err (!%p652_p2)
}
   0x9   :  { %s656_s27 = scalar_lea.vmem %s29_s19, 2048  ;;  %p661_p4 = scmp.lt.s32.totalorder %s29_s19, %s29_s19 }
   0xa   :  { %p657_p3 = scmp.ne.s32.totalorder %s29_s19, %s656_s27  ;;  %p662_p5 = scmp.lt.s32.totalorder %s656_s27, %s656_s27 }
   0xc   :  { %p663_p6 = por %p662_p5, %p661_p4 }
   0xe   :  { %p664_p7 = pnand %p663_p6, %p657_p3 }
  0x10   :  { %667 = shalt.err (!%p664_p7)
}
  0x11   :  { %s741_s28 = smov 512   ;;  %s742_s29 = smov 32  }
  0x12   :  { %34 = dma.hbm_to_vmem [thread:$0]  %s836_s1, 2048, %s29_s19, [#allocation6], %s741_s28, %s741_s28, %s742_s29  }
  0x13   :  { %s743_s7 = smov [#allocation2]   ;;  %s744_s9 = smov [#allocation7]  }
  0x14   :  { %s19_s8 = sshll.u32 %s743_s7, 4  ;;  %s42_s10 = sshll.u32 %s744_s9, 4  ;;  %s20_s8 = int_to_ptr.vmem [resolvable:$true] %s19_s8  ;;  %s43_s10 = int_to_ptr.vmem [resolvable:$true] %s42_s10 }
  0x15   :  { %s668_s13 = scalar_lea.hbm %s835_s0, 128 }
  0x16   :  { %p669_p8 = scmp.ne.s32.totalorder %s835_s0, %s668_s13  ;;  %p672_p9 = scmp.lt.u32.totalorder %s668_s13, %s835_s0 }
  0x18   :  { %p674_p10 = pnand %p672_p9, %p669_p8 }
  0x1a   :  { %677 = shalt.err (!%p674_p10)
}
  0x1b   :  { %s678_s1 = scalar_lea.vmem %s20_s8, 128  ;;  %p683_p12 = scmp.lt.s32.totalorder %s20_s8, %s20_s8 }
  0x1c   :  { %p679_p11 = scmp.ne.s32.totalorder %s20_s8, %s678_s1  ;;  %p684_p13 = scmp.lt.s32.totalorder %s678_s1, %s678_s1 }
  0x1e   :  { %p685_p0 = por %p684_p13, %p683_p12 }
  0x20   :  { %p686_p1 = pnand %p685_p0, %p679_p11 }
  0x22   :  { %689 = shalt.err (!%p686_p1)
}
  0x23   :  { %22 = dma.hbm_to_vmem [thread:$0]  %s835_s0, 128, %s20_s8, [#allocation3]  }
  0x24   :  { %s690_s22 = scalar_lea.hbm %s838_s3, 8192 }
  0x25   :  { %p691_p2 = scmp.ne.s32.totalorder %s838_s3, %s690_s22  ;;  %p694_p3 = scmp.lt.u32.totalorder %s690_s22, %s838_s3 }
  0x27   :  { %p696_p4 = pnand %p694_p3, %p691_p2 }
  0x29   :  { %699 = shalt.err (!%p696_p4)
}
  0x2a   :  { %s700_s27 = scalar_lea.vmem %s43_s10, 8192  ;;  %p705_p6 = scmp.lt.s32.totalorder %s43_s10, %s43_s10 }
  0x2b   :  { %p701_p5 = scmp.ne.s32.totalorder %s43_s10, %s700_s27  ;;  %p706_p7 = scmp.lt.s32.totalorder %s700_s27, %s700_s27 }
  0x2d   :  { %p707_p8 = por %p706_p7, %p705_p6 }
  0x2f   :  { %p708_p9 = pnand %p707_p8, %p701_p5 }
  0x31   :  { %711 = shalt.err (!%p708_p9)
}
  0x32   :  { %s745_s0 = smov 128   ;;  %s746_s28 = smov 8  }
  0x33   :  { %48 = dma.hbm_to_vmem [thread:$0]  %s838_s3, 8192, %s43_s10, [#allocation6], %s745_s0, %s745_s0, %s746_s28  }
  0x34   :  { %734 = dma.done.wait [#allocation3], 128  }
  0x35   :  { %735 = vsyncadd [#allocation3], 4294967168 }
  0x36   :  { %736 = dma.done.wait [#allocation6], 10240  }
  0x37   :  { %737 = vsyncadd [#allocation6], 4294957056  ;;  %v747_v0 = vmov 0.0   ;;  %v62_v1 = vld [vmem:[#allocation5 + $0x8] sm:$0xff]  ;;  %v64_v3 = vld [vmem:[#allocation5 + $0x18] sm:$0xff]  ;;  %vm99_vm0 = vcmask 261120  }
  0x38   :  { %167 = vmatprep.mubr.f32.mxu0 %v747_v0  ;;  %238 = vmatprep.mubr.f32.mxu1 %v747_v0  ;;  %v66_v2 = vld [vmem:[#allocation5 + $0x28] sm:$0xff]  ;;  %v68_v5 = vld [vmem:[#allocation5 + $0x38] sm:$0xff]  ;;  %v61_v6 = vld [vmem:[#allocation5] sm:$0xff]  ;;  %s748_s8 = smov [#allocation8]  }
  0x39   :  { %v553_v4 = vpack.c.bf16 %v66_v2, %v62_v1  ;;  %v65_v7 = vld [vmem:[#allocation5 + $0x20] sm:$0xff]  ;;  %v561_v8 = vpack.c.bf16 %v68_v5, %v64_v3  ;;  %v63_v10 = vld [vmem:[#allocation5 + $0x10] sm:$0xff]  ;;  %v70_v12 = vld [vmem:[#allocation5 + $0x48] sm:$0xff]  ;;  %s469_s9 = sshll.u32 %s748_s8, 4  ;;  %s470_s9 = int_to_ptr.vmem [resolvable:$true] %s469_s9 }
  0x3a   :  { %v555_v9 = vpack.c.bf16 %v65_v7, %v61_v6  ;;  %v67_v11 = vld [vmem:[#allocation5 + $0x30] sm:$0xff]  ;;  %v74_v14 = vld [vmem:[#allocation5 + $0x68] sm:$0xff]  ;;  %v72_v15 = vld [vmem:[#allocation5 + $0x58] sm:$0xff]  ;;  %s712_s10 = scalar_lea.vmem %s470_s9, 128  ;;  %p717_p11 = scmp.lt.s32.totalorder %s470_s9, %s470_s9 }
  0x3b   :  { %554 = vmatprep.subr.bf16.mxu0 %v553_v4  ;;  %v563_v13 = vpack.c.bf16 %v67_v11, %v63_v10  ;;  %v76_v16 = vld [vmem:[#allocation5 + $0x78] sm:$0xff]  ;;  %562 = vmatprep.subr.bf16.mxu1 %v561_v8  ;;  %v557_v17 = vpack.c.bf16 %v74_v14, %v70_v12  ;;  %v69_v19 = vld [vmem:[#allocation5 + $0x40] sm:$0xff]  ;;  %v71_v21 = vld [vmem:[#allocation5 + $0x50] sm:$0xff]  ;;  %p713_p10 = scmp.ne.s32.totalorder %s470_s9, %s712_s10  ;;  %p718_p12 = scmp.lt.s32.totalorder %s712_s10, %s712_s10 }
  0x3c   :  { %556 = vmatpush1.bf16.msra.mxu0 %v555_v9  ;;  %v565_v18 = vpack.c.bf16 %v76_v16, %v72_v15  ;;  %v73_v20 = vld [vmem:[#allocation5 + $0x60] sm:$0xff]  ;;  %v75_v23 = vld [vmem:[#allocation5 + $0x70] sm:$0xff]  ;;  %v60_v26 = vld [vmem:[#allocation2] sm:$0xff] }
  0x3d   :  { %564 = vmatpush1.bf16.msra.mxu1 %v563_v13  ;;  %v559_v22 = vpack.c.bf16 %v73_v20, %v69_v19  ;;  %v261_v24 = vld [vmem:[#allocation7 + $0x80] sm:$0xff]  ;;  %558 = vmatprep.subr.bf16.mxu0 %v557_v17  ;;  %v567_v25 = vpack.c.bf16 %v75_v23, %v71_v21  ;;  %v262_v27 = vld [vmem:[#allocation7 + $0x88] sm:$0xff]  ;;  %v263_v37 = vld [vmem:[#allocation7 + $0x90] sm:$0xff]  ;;  %p719_p13 = por %p718_p12, %p717_p11 }
  0x3e   :  { %566 = vmatprep.subr.bf16.mxu1 %v565_v18  ;;  %v293_v28 = vld [vmem:[#allocation7 + $0x180] sm:$0xff]  ;;  %v294_v29 = vld [vmem:[#allocation7 + $0x188] sm:$0xff]  ;;  %v569_v30 = vpack.c.bf16 %v262_v27, %v261_v24  ;;  %v264_v38 = vld [vmem:[#allocation7 + $0x98] sm:$0xff] }
  0x3f   :  { %v601_v31 = vpack.c.bf16 %v294_v29, %v293_v28  ;;  %v245_v32 = vld [vmem:[#allocation7] sm:$0xff]  ;;  %v246_v33 = vld [vmem:[#allocation7 + $0x8] sm:$0xff]  ;;  %v573_v40 = vpack.c.bf16 %v264_v38, %v263_v37  ;;  %v295_v41 = vld [vmem:[#allocation7 + $0x190] sm:$0xff]  ;;  %p720_p0 = pnand %p719_p13, %p713_p10 }
  0x40   :  { %v277_v34 = vld [vmem:[#allocation7 + $0x100] sm:$0xff]  ;;  %560 = vmatpush1.bf16.msra.mxu0 %v559_v22  ;;  %v571_v35 = vpack.c.bf16 %v246_v33, %v245_v32  ;;  %v278_v36 = vld [vmem:[#allocation7 + $0x108] sm:$0xff]  ;;  %v296_v42 = vld [vmem:[#allocation7 + $0x198] sm:$0xff] }
  0x41   :  { %568 = vmatpush1.bf16.msra.mxu1 %v567_v25  ;;  %570 = vmatprep.subr.bf16.mxu0 %v569_v30  ;;  %v603_v39 = vpack.c.bf16 %v278_v36, %v277_v34  ;;  %v247_v43 = vld [vmem:[#allocation7 + $0x10] sm:$0xff]  ;;  %v605_v44 = vpack.c.bf16 %v296_v42, %v295_v41  ;;  %v248_v45 = vld [vmem:[#allocation7 + $0x18] sm:$0xff]  ;;  %v265_v48 = vld [vmem:[#allocation7 + $0xa0] sm:$0xff] }
  0x42   :  { %602 = vmatprep.subr.bf16.mxu1 %v601_v31  ;;  %v279_v46 = vld [vmem:[#allocation7 + $0x110] sm:$0xff]  ;;  %v280_v47 = vld [vmem:[#allocation7 + $0x118] sm:$0xff]  ;;  %v266_v49 = vld [vmem:[#allocation7 + $0xa8] sm:$0xff]  ;;  %v575_v51 = vpack.c.bf16 %v248_v45, %v247_v43 }
  0x43   :  { %479 = vmatmul.mubr.msk.f32.vlgmr.msra.gmra.mrb[0].mxu0 %vm99_vm0, %v60_v26  ;;  %v297_v50 = vld [vmem:[#allocation7 + $0x1a0] sm:$0xff]  ;;  %v298_v52 = vld [vmem:[#allocation7 + $0x1a8] sm:$0xff]  ;;  %v607_v53 = vpack.c.bf16 %v280_v47, %v279_v46  ;;  %v577_v54 = vpack.c.bf16 %v266_v49, %v265_v48  ;;  %v267_v60 = vld [vmem:[#allocation7 + $0xb0] sm:$0xff] }
  0x44   :  { %480 = vmatmul.mubr.msk.f32.vlgmr.msra.gmra.mrb[0].mxu1 %vm99_vm0, %v60_v26  ;;  %572 = vmatpush3.bf16.msra.mxu0 %v571_v35  ;;  %v249_v55 = vld [vmem:[#allocation7 + $0x20] sm:$0xff]  ;;  %v250_v56 = vld [vmem:[#allocation7 + $0x28] sm:$0xff]  ;;  %v609_v58 = vpack.c.bf16 %v298_v52, %v297_v50  ;;  %v268_v61 = vld [vmem:[#allocation7 + $0xb8] sm:$0xff] }
  0x45   :  { %604 = vmatpush3.bf16.msra.mxu1 %v603_v39  ;;  %574 = vmatprep.subr.bf16.mxu0 %v573_v40  ;;  %v281_v57 = vld [vmem:[#allocation7 + $0x120] sm:$0xff]  ;;  %v282_v59 = vld [vmem:[#allocation7 + $0x128] sm:$0xff]  ;;  %v299_v62 = vld [vmem:[#allocation7 + $0x1b0] sm:$0xff]  ;;  %v579_v0 = vpack.c.bf16 %v250_v56, %v249_v55  ;;  %v581_v2 = vpack.c.bf16 %v268_v61, %v267_v60 }
  0x46   :  { %606 = vmatprep.subr.bf16.mxu1 %v605_v44  ;;  %v300_v63 = vld [vmem:[#allocation7 + $0x1b8] sm:$0xff]  ;;  %v611_v1 = vpack.c.bf16 %v282_v59, %v281_v57  ;;  %v251_v3 = vld [vmem:[#allocation7 + $0x30] sm:$0xff]  ;;  %v269_v8 = vld [vmem:[#allocation7 + $0xc0] sm:$0xff] }
  0x47   :  { %v252_v4 = vld [vmem:[#allocation7 + $0x38] sm:$0xff]  ;;  %v283_v5 = vld [vmem:[#allocation7 + $0x130] sm:$0xff]  ;;  %v613_v6 = vpack.c.bf16 %v300_v63, %v299_v62  ;;  %v270_v9 = vld [vmem:[#allocation7 + $0xc8] sm:$0xff] }
  0x48   :  { %576 = vmatpush3.bf16.msra.mxu0 %v575_v51  ;;  %v284_v7 = vld [vmem:[#allocation7 + $0x138] sm:$0xff]  ;;  %v301_v10 = vld [vmem:[#allocation7 + $0x1c0] sm:$0xff]  ;;  %v302_v11 = vld [vmem:[#allocation7 + $0x1c8] sm:$0xff]  ;;  %v583_v12 = vpack.c.bf16 %v252_v4, %v251_v3  ;;  %v585_v14 = vpack.c.bf16 %v270_v9, %v269_v8 }
  0x49   :  { %608 = vmatpush3.bf16.msra.mxu1 %v607_v53  ;;  %578 = vmatprep.subr.bf16.mxu0 %v577_v54  ;;  %v615_v13 = vpack.c.bf16 %v284_v7, %v283_v5  ;;  %v253_v15 = vld [vmem:[#allocation7 + $0x40] sm:$0xff]  ;;  %v254_v16 = vld [vmem:[#allocation7 + $0x48] sm:$0xff]  ;;  %v617_v18 = vpack.c.bf16 %v302_v11, %v301_v10  ;;  %v271_v20 = vld [vmem:[#allocation7 + $0xd0] sm:$0xff] }
  0x4a   :  { %610 = vmatprep.subr.bf16.mxu1 %v609_v58  ;;  %v285_v17 = vld [vmem:[#allocation7 + $0x140] sm:$0xff]  ;;  %v286_v19 = vld [vmem:[#allocation7 + $0x148] sm:$0xff]  ;;  %v272_v21 = vld [vmem:[#allocation7 + $0xd8] sm:$0xff]  ;;  %v587_v24 = vpack.c.bf16 %v254_v16, %v253_v15  ;;  %v79_v58 = vlaneseq }
  0x4b   :  { %v303_v22 = vld [vmem:[#allocation7 + $0x1d0] sm:$0xff]  ;;  %v304_v23 = vld [vmem:[#allocation7 + $0x1d8] sm:$0xff]  ;;  %v619_v25 = vpack.c.bf16 %v286_v19, %v285_v17  ;;  %v589_v26 = vpack.c.bf16 %v272_v21, %v271_v20  ;;  %v273_v32 = vld [vmem:[#allocation7 + $0xe0] sm:$0xff] }
  0x4c   :  { %580 = vmatpush3.bf16.msra.mxu0 %v579_v0  ;;  %v255_v27 = vld [vmem:[#allocation7 + $0x50] sm:$0xff]  ;;  %v256_v28 = vld [vmem:[#allocation7 + $0x58] sm:$0xff]  ;;  %v621_v30 = vpack.c.bf16 %v304_v23, %v303_v22  ;;  %v274_v33 = vld [vmem:[#allocation7 + $0xe8] sm:$0xff]  ;;  %v80_v59 = vshrl.u32 %v79_v58, 7 }
  0x4d   :  { %612 = vmatpush3.bf16.msra.mxu1 %v611_v1  ;;  %582 = vmatprep.subr.bf16.mxu0 %v581_v2  ;;  %v287_v29 = vld [vmem:[#allocation7 + $0x150] sm:$0xff]  ;;  %v288_v31 = vld [vmem:[#allocation7 + $0x158] sm:$0xff]  ;;  %v305_v34 = vld [vmem:[#allocation7 + $0x1e0] sm:$0xff]  ;;  %v591_v36 = vpack.c.bf16 %v256_v28, %v255_v27  ;;  %v593_v38 = vpack.c.bf16 %v274_v33, %v273_v32 }
  0x4e   :  { %614 = vmatprep.subr.bf16.mxu1 %v613_v6  ;;  %v306_v35 = vld [vmem:[#allocation7 + $0x1e8] sm:$0xff]  ;;  %v623_v37 = vpack.c.bf16 %v288_v31, %v287_v29  ;;  %v257_v39 = vld [vmem:[#allocation7 + $0x60] sm:$0xff]  ;;  %v275_v46 = vld [vmem:[#allocation7 + $0xf0] sm:$0xff]  ;;  %v89_v60 = vsub.s32 2, %v80_v59  ;;  %v85_v61 = vsub.s32 1, %v80_v59  ;;  %v81_v63 = vsub.s32 0, %v80_v59 }
  0x4f   :  { %v258_v40 = vld [vmem:[#allocation7 + $0x68] sm:$0xff]  ;;  %v625_v41 = vpack.c.bf16 %v306_v35, %v305_v34  ;;  %v289_v42 = vld [vmem:[#allocation7 + $0x160] sm:$0xff]  ;;  %v276_v47 = vld [vmem:[#allocation7 + $0xf8] sm:$0xff]  ;;  %v93_v0 = vsub.s32 3, %v80_v59 }
  0x50   :  { %584 = vmatpush3.bf16.msra.mxu0 %v583_v12  ;;  %v290_v43 = vld [vmem:[#allocation7 + $0x168] sm:$0xff]  ;;  %v595_v44 = vpack.c.bf16 %v258_v40, %v257_v39  ;;  %v307_v48 = vld [vmem:[#allocation7 + $0x1f0] sm:$0xff]  ;;  %v597_v49 = vpack.c.bf16 %v276_v47, %v275_v46  ;;  %v308_v50 = vld [vmem:[#allocation7 + $0x1f8] sm:$0xff] }
  0x51   :  { %616 = vmatpush3.bf16.msra.mxu1 %v615_v13  ;;  %586 = vmatprep.subr.bf16.mxu0 %v585_v14  ;;  %v627_v45 = vpack.c.bf16 %v290_v43, %v289_v42  ;;  %v259_v51 = vld [vmem:[#allocation7 + $0x70] sm:$0xff]  ;;  %v260_v52 = vld [vmem:[#allocation7 + $0x78] sm:$0xff]  ;;  %v629_v53 = vpack.c.bf16 %v308_v50, %v307_v48 }
  0x52   :  { %618 = vmatprep.subr.bf16.mxu1 %v617_v18  ;;  %v599_v54 = vpack.c.bf16 %v260_v52, %v259_v51  ;;  %v291_v55 = vld [vmem:[#allocation7 + $0x170] sm:$0xff]  ;;  %v292_v56 = vld [vmem:[#allocation7 + $0x178] sm:$0xff] }
  0x53   :  { %v631_v57 = vpack.c.bf16 %v292_v56, %v291_v55  ;;  %v77_v62 = vld [vmem:[%s837_s2] sm:$0xf] }
  0x54   :  { %588 = vmatpush3.bf16.msra.mxu0 %v587_v24  ;;  %v90_v1 = vrot.slane %v77_v62, %v89_v60  ;;  %v86_v2 = vrot.slane %v77_v62, %v85_v61  ;;  %v82_v3 = vrot.slane %v77_v62, %v81_v63  ;;  %v94_v4 = vrot.slane %v77_v62, %v93_v0  ;;  %v481_v15 = vld [vmem:[%s839_s4] ss:$0 sm:$0xff] }
  0x55   :  { %620 = vmatpush3.bf16.msra.mxu1 %v619_v25  ;;  %590 = vmatprep.subr.bf16.mxu0 %v589_v26 }
  0x56   :  { %622 = vmatprep.subr.bf16.mxu1 %v621_v30 }
  0x58   :  { %592 = vmatpush3.bf16.msra.mxu0 %v591_v36 }
  0x59   :  { %624 = vmatpush3.bf16.msra.mxu1 %v623_v37  ;;  %594 = vmatprep.subr.bf16.mxu0 %v593_v38 }
  0x5a   :  { %626 = vmatprep.subr.bf16.mxu1 %v625_v41 }
  0x5c   :  { %596 = vmatpush3.bf16.msra.mxu0 %v595_v44 }
  0x5d   :  { %628 = vmatpush3.bf16.msra.mxu1 %v627_v45  ;;  %598 = vmatprep.subr.bf16.mxu0 %v597_v49 }
  0x5e   :  { %630 = vmatprep.subr.bf16.mxu1 %v629_v53 }
  0x60   :  { %600 = vmatpush3.bf16.msra.mxu0 %v599_v54 }
  0x61   :  { %632 = vmatpush3.bf16.msra.mxu1 %v631_v57 }
 0x116   :  { %v169_v5 = vpop.f32.mrb[0].mxu0 }
 0x117   :  { %v240_v6 = vpop.f32.mrb[0].mxu1  ;;  %v171_v7 = vpop.f32.mrb[1].mxu0  ;;  %v170_v11 = vadd.f32 %v169_v5, %v82_v3 }
 0x118   :  { %v241_v8 = vadd.f32 %v240_v6, %v90_v1  ;;  %v172_v9 = vadd.f32 %v171_v7, %v86_v2  ;;  %v242_v10 = vpop.f32.mrb[1].mxu1 }
 0x119   :  { %v243_v12 = vadd.f32 %v242_v10, %v94_v4 }
 0x11a   :  { %380 = vmatprep.mubr.f32.mxu0 %v172_v9 }
 0x11b   :  { %450 = vmatprep.mubr.f32.mxu1 %v243_v12  ;;  %381 = vmatmul.mubr.f32.vlgmr.msra.gmra.mrb[2].mxu0 %v170_v11 }
 0x11c   :  { %451 = vmatmul.mubr.f32.vlgmr.msra.gmra.mrb[2].mxu1 %v241_v8 }
 0x1ee   :  { %v515_v13 = vpop.f32.mrb[2].mxu0 }
 0x1ef   :  { %v550_v14 = vpop.f32.mrb[2].mxu1  ;;  %v516_v16 = vpop.f32.mrb[3].mxu0 }
 0x1f0   :  { %v517_v17 = vadd.f32 %v516_v16, %v515_v13  ;;  %v551_v18 = vpop.f32.mrb[3].mxu1 }
 0x1f1   :  { %v552_v19 = vadd.f32 %v551_v18, %v550_v14 }
 0x1f2   :  { %v383_v20 = vadd.f32 %v517_v17, %v481_v15 }
 0x1f4   :  { %v453_v21 = vadd.f32 %v552_v19, %v383_v20 }
 0x1f6   :  { %v482_v22 = vmul.f32 -1.442695, %v453_v21 }
 0x1f8   :  { %642 = vpow2.f32 %v482_v22 }
 0x202   :  { %v643_v23 = vpop.eup %642 }
 0x203   :  { %v459_v24 = vadd.f32 1.0, %v643_v23 }
 0x205   :  { %644 = vrcp.f32 %v459_v24 }
 0x20f   :  { %v645_v25 = vpop.eup %644 }
 0x210   :  { %462 = vst [vmem:[#allocation8] sm:$0xff] %v645_v25 }
 0x211   :  { %723 = shalt.err (!%p720_p0)
}
 0x212   :  { %s724_s12 = scalar_lea.hbm %s840_s5, 128 }
 0x213   :  { %p725_p1 = scmp.ne.s32.totalorder %s840_s5, %s724_s12  ;;  %p728_p2 = scmp.lt.u32.totalorder %s724_s12, %s840_s5 }
 0x215   :  { %p730_p3 = pnand %p728_p2, %p725_p1 }
 0x217   :  { %733 = shalt.err (!%p730_p3)
}
 0x218   :  { %472 = dma.vmem_to_hbm [thread:$0]  %s470_s9, 128, %s840_s5, [#allocation4]  }
 0x219   :  { %738 = dma.done.wait [#allocation4], 128  }
 0x21a   :  { %739 = vsyncadd [#allocation4], 4294967168 }
 0x21b   :  { %476 = vsyncpa [#allocation3], 1 }
 0x21c   :  { %477 = vsyncpa [#allocation6], 1 }
 0x21d   :  { %478 = vsyncpa [#allocation4], 1 }

</bundles_post_ra>
